<compile_context>
chip_gen: v7x
topology: tpu7x:2x2x1
jax: 0.10.0
libtpu: 0.0.40
codegen_flags: <defaults>
</compile_context>

<pallas_src>
import jax
import jax.numpy as jnp
from jax.experimental import pallas as pl
from jax.experimental.pallas import tpu as pltpu


# ----------------------------- Pass 1: conv + per-channel stats -----------------------------
def _conv_stats_kernel(xp_ref, w_ref, y_ref, s1_ref, s2_ref):
    # xp_ref: (1, H+2, W+2, C) bf16 (resident per batch)
    # w_ref : (9, C, t_co)      bf16 (standardized, per-tap)
    # y_ref : (1, t_h*W, t_co)  bf16 (streamed raw conv output, no bias)
    # s1/s2 : (1, 1, t_co)      f32  (resident per (batch, channel-chunk) accumulators)
    hi = pl.program_id(2)
    t_hw = y_ref.shape[1]
    C = xp_ref.shape[3]
    W = xp_ref.shape[2] - 2
    t_h = t_hw // W

    @pl.when(hi == 0)
    def _init():
        s1_ref[...] = jnp.zeros_like(s1_ref)
        s2_ref[...] = jnp.zeros_like(s2_ref)

    row0 = pl.multiple_of(hi * t_h, t_h)
    acc = jnp.zeros((t_hw, y_ref.shape[2]), jnp.float32)
    # 9 accumulated bf16 matmuls over shifted slices of the padded image (f32 accumulation)
    for kh in range(3):
        for kw in range(3):
            xs = xp_ref[0, pl.ds(row0 + kh, t_h), pl.ds(kw, W), :]   # (t_h, W, C) bf16
            xs = xs.reshape(t_hw, C)
            acc = acc + jnp.dot(xs, w_ref[kh * 3 + kw],
                                preferred_element_type=jnp.float32)

    y_ref[0] = acc.astype(y_ref.dtype)                               # streamed bf16 slab
    s1_ref[0] += jnp.sum(acc, axis=0, keepdims=True)                 # (1, t_co) f32
    s2_ref[0] += jnp.sum(acc * acc, axis=0, keepdims=True)


# ----------------------------- Pass 2: folded affine + SiLU (streamed) -----------------------------
def _norm_act_kernel(y_ref, a_ref, b_ref, o_ref):
    # y_ref: (1, t_hw, t_co) bf16 raw conv; a/b_ref: (1, 1, t_co) f32; o_ref: (1, t_hw, t_co) f32
    z = y_ref[0].astype(jnp.float32) * a_ref[0] + b_ref[0]
    o_ref[0] = (z * pl.reciprocal(1.0 + jnp.exp(-z), approx=True)).astype(o_ref.dtype)


# ----------------------------- tile / VMEM helpers -----------------------------
def _pick_row_tile(H, W, target_elems=512):
    """Largest divisor t of H with (t*W) lane/sublane-friendly and t*W <= target."""
    cands = [t for t in range(1, H + 1)
             if H % t == 0 and (t == H or (t * W) % 8 == 0)]
    fitting = [t for t in cands if t * W <= target_elems]
    return max(fitting) if fitting else min(cands)


def _pick_hw_tile(HW, target_elems=4096):
    cands = [t for t in range(1, HW + 1)
             if HW % t == 0 and (t == HW or t % 8 == 0)]
    fitting = [t for t in cands if t <= target_elems]
    return max(fitting) if fitting else min(cands)


def _vmem_limit(block_bytes):
    """Derive the scoped-VMEM limit from actual pipeline window sizes (v7x-friendly cap)."""
    buffered = 2 * int(sum(block_bytes))              # double-buffered pipeline windows
    want = 2 * buffered + (4 << 20)                   # + live values / relayout headroom
    return int(min(max(want, 32 << 20), max(48 << 20, buffered + (8 << 20))))


# ----------------------------- wrapper -----------------------------
def block_forward(x, w, b, gamma, beta, scale_shift=None, groups=8,
                  row_tile=None, cout_tile=None):
    """Block forward.  x: (B, C, H, W) f32 NCHW, w: (Cout, C, 3, 3).  Returns (B, Cout, H, W) f32."""
    B, C, H, W = x.shape
    Cout = w.shape[0]
    HW = H * W
    assert Cout % groups == 0
    cpg = Cout // groups

    # ---- weight standardization, hoisted (tiny, computed once) ----
    w = w.astype(jnp.float32)
    mean_w = jnp.mean(w, axis=(1, 2, 3), keepdims=True)
    var_w = jnp.var(w, axis=(1, 2, 3), keepdims=True)                 # unbiased=False
    w_std = (w - mean_w) * jax.lax.rsqrt(var_w + 1e-5)                # eps for f32 inputs
    # (Cout, C, 3, 3) -> (tap=kh*3+kw, C, Cout), bf16 for the MXU
    w_taps = jnp.transpose(w_std, (2, 3, 1, 0)).reshape(9, C, Cout).astype(jnp.bfloat16)

    # ---- padded NHWC input (bf16); conv patches are built in-kernel from this halo ----
    # TODO(synk): for very large H*W*C the resident padded image block should itself be
    #             row-tiled with pl.Element halo offsets instead of kept whole in VMEM.
    x_nhwc = jnp.transpose(x, (0, 2, 3, 1))
    xp = jnp.pad(x_nhwc, ((0, 0), (1, 1), (1, 1), (0, 0))).astype(jnp.bfloat16)

    # ---- tiling ----
    t_h = row_tile if row_tile is not None else _pick_row_tile(H, W)
    assert H % t_h == 0 and (t_h == H or (t_h * W) % 8 == 0), (H, W, t_h)
    n_h = H // t_h
    t_hw = t_h * W

    if cout_tile is not None:
        t_co = cout_tile
    else:
        t_co = Cout
        for cand in (256, 128):                       # lane/MXU aligned channel chunks
            if Cout > cand and Cout % cand == 0:
                t_co = cand
                break
    assert Cout % t_co == 0 and (t_co == Cout or t_co % 128 == 0), (Cout, t_co)
    n_co = Cout // t_co

    # ---- pass 1: conv (bf16 MXU) + per-channel raw sums ----
    p1_blocks = [
        (H + 2) * (W + 2) * C * 2,      # resident padded input
        9 * C * t_co * 2,               # weights
        t_hw * t_co * 2,                # streamed conv output tile
        2 * t_co * 4,                   # stats accumulators
    ]
    cost1 = pl.CostEstimate(
        flops=2 * B * HW * 9 * C * Cout,
        transcendentals=0,
        bytes_accessed=int(xp.size) * 2 + int(w_taps.size) * 2
        + B * HW * Cout * 2 + 2 * B * Cout * 4)

    y_conv, s1, s2 = pl.pallas_call(
        _conv_stats_kernel,
        out_shape=(jax.ShapeDtypeStruct((B, HW, Cout), jnp.bfloat16),
                   jax.ShapeDtypeStruct((B, 1, Cout), jnp.float32),
                   jax.ShapeDtypeStruct((B, 1, Cout), jnp.float32)),
        grid_spec=pltpu.PrefetchScalarGridSpec(
            num_scalar_prefetch=0,
            grid=(B, n_co, n_h),
            in_specs=[
                pl.BlockSpec((1, H + 2, W + 2, C), lambda bi, ci, hi: (bi, 0, 0, 0)),
                pl.BlockSpec((9, C, t_co), lambda bi, ci, hi: (0, 0, ci)),
            ],
            out_specs=(
                pl.BlockSpec((1, t_hw, t_co), lambda bi, ci, hi: (bi, hi, ci)),
                pl.BlockSpec((1, 1, t_co), lambda bi, ci, hi: (bi, 0, ci)),
                pl.BlockSpec((1, 1, t_co), lambda bi, ci, hi: (bi, 0, ci)),
            ),
        ),
        compiler_params=pltpu.CompilerParams(
            dimension_semantics=("parallel", "parallel", "arbitrary"),
            vmem_limit_bytes=_vmem_limit(p1_blocks)),
        cost_estimate=cost1,
    )(xp, w_taps)

    # ---- tiny O(B*Cout) wrapper math: bias + GroupNorm stats + affine + scale/shift fold ----
    bias = b.reshape(1, 1, Cout).astype(jnp.float32)
    s1b = s1 + float(HW) * bias                              # sums of biased activations
    s2b = s2 + 2.0 * bias * s1 + float(HW) * bias * bias
    n = float(HW * cpg)
    gs1 = s1b.reshape(B, groups, cpg).sum(axis=-1)           # (B, groups)
    gs2 = s2b.reshape(B, groups, cpg).sum(axis=-1)
    gmean = gs1 / n
    gvar = jnp.maximum(gs2 / n - gmean * gmean, 0.0)         # population variance
    ginv = jax.lax.rsqrt(gvar + 1e-5)                        # GroupNorm eps
    mean_c = jnp.repeat(gmean, cpg, axis=-1).reshape(B, 1, Cout)
    inv_c = jnp.repeat(ginv, cpg, axis=-1).reshape(B, 1, Cout)

    gamma_v = gamma.reshape(1, 1, Cout).astype(jnp.float32)
    beta_v = beta.reshape(1, 1, Cout).astype(jnp.float32)
    A = inv_c * gamma_v                                      # y_raw*A + Bc == GN(y)+affine
    Bc = (bias - mean_c) * A + beta_v
    if scale_shift is not None:
        s, sh = scale_shift
        sc = jnp.reshape(s, (B, 1, Cout)).astype(jnp.float32) + 1.0
        A = A * sc
        Bc = Bc * sc + jnp.reshape(sh, (B, 1, Cout)).astype(jnp.float32)

    # ---- pass 2: streamed normalize + SiLU ----
    t_hw2 = _pick_hw_tile(HW)
    n_hw2 = HW // t_hw2
    p2_blocks = [t_hw2 * t_co * 2, t_co * 4, t_co * 4, t_hw2 * t_co * 4]
    cost2 = pl.CostEstimate(
        flops=4 * B * HW * Cout,
        transcendentals=2 * B * HW * Cout,
        bytes_accessed=B * HW * Cout * (2 + 4) + 2 * B * Cout * 4)

    out = pl.pallas_call(
        _norm_act_kernel,
        out_shape=jax.ShapeDtypeStruct((B, HW, Cout), jnp.float32),
        grid_spec=pltpu.PrefetchScalarGridSpec(
            num_scalar_prefetch=0,
            grid=(B, n_co, n_hw2),
            in_specs=[
                pl.BlockSpec((1, t_hw2, t_co), lambda bi, ci, hi: (bi, hi, ci)),
                pl.BlockSpec((1, 1, t_co), lambda bi, ci, hi: (bi, 0, ci)),
                pl.BlockSpec((1, 1, t_co), lambda bi, ci, hi: (bi, 0, ci)),
            ],
            out_specs=pl.BlockSpec((1, t_hw2, t_co), lambda bi, ci, hi: (bi, hi, ci)),
        ),
        compiler_params=pltpu.CompilerParams(
            dimension_semantics=("parallel", "parallel", "parallel"),
            vmem_limit_bytes=_vmem_limit(p2_blocks)),
        cost_estimate=cost2,
    )(y_conv, A, Bc)

    # (B, HW, Cout) -> NCHW
    return out.reshape(B, H, W, Cout).transpose(0, 3, 1, 2)


# ----------------------------- pure-JAX reference -----------------------------
def block_ref(x, w, b, gamma, beta, scale_shift=None, groups=8):
    """Pure-JAX f32 reference mirroring PyTorch Block.forward."""
    mean = w.mean(axis=(1, 2, 3), keepdims=True)
    var = w.var(axis=(1, 2, 3), keepdims=True)
    w_std = (w - mean) * jax.lax.rsqrt(var + 1e-5)
    y = jax.lax.conv_general_dilated(x, w_std, (1, 1), ((1, 1), (1, 1)),
                                     dimension_numbers=("NCHW", "OIHW", "NCHW"))
    y = y + b.reshape(1, -1, 1, 1)
    B, C, H, W = y.shape
    yg = y.reshape(B, groups, C // groups, H, W)
    m = yg.mean(axis=(2, 3, 4), keepdims=True)
    v = yg.var(axis=(2, 3, 4), keepdims=True)
    yn = ((yg - m) * jax.lax.rsqrt(v + 1e-5)).reshape(B, C, H, W)
    out = yn * gamma.reshape(1, -1, 1, 1) + beta.reshape(1, -1, 1, 1)
    if scale_shift is not None:
        s, sh = scale_shift
        out = out * (s.reshape(B, -1, 1, 1) + 1.0) + sh.reshape(B, -1, 1, 1)
    return out * jax.nn.sigmoid(out)


if __name__ == "__main__":
    B, C, H, W = 2, 4, 16, 16
    Cout, groups = 16, 8

    key = jax.random.PRNGKey(0)
    k1, k2, k3, k4, k5, k6, k7 = jax.random.split(key, 7)
    x = jax.random.normal(k1, (B, C, H, W), jnp.float32)
    w = 0.1 * jax.random.normal(k2, (Cout, C, 3, 3), jnp.float32)
    b = 0.1 * jax.random.normal(k3, (Cout,), jnp.float32)
    gamma = 1.0 + 0.1 * jax.random.normal(k4, (Cout,), jnp.float32)
    beta = 0.1 * jax.random.normal(k5, (Cout,), jnp.float32)
    scale = 0.1 * jax.random.normal(k6, (B, Cout), jnp.float32)
    shift = 0.1 * jax.random.normal(k7, (B, Cout), jnp.float32)

    # row_tile=4 -> 4 spatial tiles per image: exercises the streamed conv output tiles
    # and the resident per-channel stats accumulator across the "arbitrary" axis.
    out = block_forward(x, w, b, gamma, beta, scale_shift=None, groups=groups, row_tile=4)
    out = jax.block_until_ready(out)
    ref = block_ref(x, w, b, gamma, beta, scale_shift=None, groups=groups)
    assert out.shape == (B, Cout, H, W), out.shape
    # bf16 MXU operands + bf16 conv slab -> looser tolerance than pure-f32
    assert jnp.allclose(out, ref, rtol=5e-2, atol=5e-2), float(jnp.max(jnp.abs(out - ref)))

    # scale_shift path
    out2 = block_forward(x, w, b, gamma, beta, scale_shift=(scale, shift),
                         groups=groups, row_tile=4)
    out2 = jax.block_until_ready(out2)
    ref2 = block_ref(x, w, b, gamma, beta, scale_shift=(scale, shift), groups=groups)
    assert jnp.allclose(out2, ref2, rtol=5e-2, atol=5e-2), float(jnp.max(jnp.abs(out2 - ref2)))

    print("KERNEL_OK")
</pallas_src>

<mosaic_0001>
module attributes {stable_mosaic.version = 11 : i64} {
  func.func @_conv_stats_kernel(%arg0: i32, %arg1: i32, %arg2: i32, %arg3: memref<1x18x18x4xbf16, #tpu.memory_space<vmem>>, %arg4: memref<9x4x16xbf16, #tpu.memory_space<vmem>>, %arg5: memref<1x64x16xbf16, #tpu.memory_space<vmem>>, %arg6: memref<1x1x16xf32, #tpu.memory_space<vmem>>, %arg7: memref<1x1x16xf32, #tpu.memory_space<vmem>>) attributes {dimension_semantics = [#tpu.dimension_semantics<parallel>, #tpu.dimension_semantics<parallel>, #tpu.dimension_semantics<arbitrary>], iteration_bounds = array<i64: 2, 1, 4>, scalar_prefetch = 0 : i64, scratch_operands = 0 : i64, tpu.core_type = #tpu.core_type<tc>, window_params = [{transform_indices = @transform_0, window_bounds = array<i64: 1, 18, 18, 4>}, {transform_indices = @transform_1, window_bounds = array<i64: 9, 4, 16>}, {transform_indices = @transform_2, window_bounds = array<i64: 1, 64, 16>}, {transform_indices = @transform_3, window_bounds = array<i64: 1, 1, 16>}, {transform_indices = @transform_4, window_bounds = array<i64: 1, 1, 16>}]} {
    %c0_i32 = arith.constant 0 : i32
    %0 = arith.cmpi eq, %arg2, %c0_i32 : i32
    %1 = arith.extui %0 : i1 to i32
    %c0_i32_0 = arith.constant 0 : i32
    %2 = arith.cmpi ne, %1, %c0_i32_0 : i32
    scf.if %2 {
      %cst_79 = arith.constant 0.000000e+00 : f32
      %108 = vector.broadcast %cst_79 : f32 to vector<1x1x16xf32>
      %c0_80 = arith.constant 0 : index
      %c0_81 = arith.constant 0 : index
      %c0_82 = arith.constant 0 : index
      %109 = vector.load %arg6[%c0_80, %c0_81, %c0_82] : memref<1x1x16xf32, #tpu.memory_space<vmem>>, vector<1x1x16xf32>
      tpu.vector_store %arg6[%c0_80, %c0_81, %c0_82], %108 {strides = array<i32>} : memref<1x1x16xf32, #tpu.memory_space<vmem>>, vector<1x1x16xf32>,
      %cst_83 = arith.constant 0.000000e+00 : f32
      %110 = vector.broadcast %cst_83 : f32 to vector<1x1x16xf32>
      %c0_84 = arith.constant 0 : index
      %c0_85 = arith.constant 0 : index
      %c0_86 = arith.constant 0 : index
      %111 = vector.load %arg7[%c0_84, %c0_85, %c0_86] : memref<1x1x16xf32, #tpu.memory_space<vmem>>, vector<1x1x16xf32>
      tpu.vector_store %arg7[%c0_84, %c0_85, %c0_86], %110 {strides = array<i32>} : memref<1x1x16xf32, #tpu.memory_space<vmem>>, vector<1x1x16xf32>,
    } else {
    }
    %c4_i32 = arith.constant 4 : i32
    %3 = arith.muli %arg2, %c4_i32 : i32
    %4 = tpu.assume_multiple %3, 4 : i32
    %cst = arith.constant 0.000000e+00 : f32
    %5 = vector.broadcast %cst : f32 to vector<64x16xf32>
    %c0_i32_1 = arith.constant 0 : i32
    %6 = arith.addi %4, %c0_i32_1 : i32
    %c0 = arith.constant 0 : index
    %7 = arith.index_cast %6 : i32 to index
    %c0_2 = arith.constant 0 : index
    %c0_3 = arith.constant 0 : index
    %8 = vector.load %arg3[%c0, %7, %c0_2, %c0_3] : memref<1x18x18x4xbf16, #tpu.memory_space<vmem>>, vector<1x4x16x4xbf16>
    %9 = vector.shape_cast %8 : vector<1x4x16x4xbf16> to vector<4x16x4xbf16>
    %10 = vector.shape_cast %9 : vector<4x16x4xbf16> to vector<64x4xbf16>
    %c0_4 = arith.constant 0 : index
    %c0_5 = arith.constant 0 : index
    %c0_6 = arith.constant 0 : index
    %11 = vector.load %arg4[%c0_4, %c0_5, %c0_6] : memref<9x4x16xbf16, #tpu.memory_space<vmem>>, vector<1x4x16xbf16>
    %12 = vector.shape_cast %11 : vector<1x4x16xbf16> to vector<4x16xbf16>
    %cst_7 = arith.constant dense<0.000000e+00> : vector<64x16xf32>
    %13 = tpu.matmul %10, %12, %cst_7 {dimension_numbers = #tpu.dot_dimension_numbers<[1], [0], [0], [1], [0, 0, 1, 1], [], []>} : vector<64x4xbf16>, vector<4x16xbf16>, vector<64x16xf32> -> vector<64x16xf32>
    %14 = arith.addf %5, %13 : vector<64x16xf32>
    %c0_i32_8 = arith.constant 0 : i32
    %15 = arith.addi %4, %c0_i32_8 : i32
    %c0_9 = arith.constant 0 : index
    %16 = arith.index_cast %15 : i32 to index
    %c1 = arith.constant 1 : index
    %c0_10 = arith.constant 0 : index
    %17 = vector.load %arg3[%c0_9, %16, %c1, %c0_10] : memref<1x18x18x4xbf16, #tpu.memory_space<vmem>>, vector<1x4x16x4xbf16>
    %18 = vector.shape_cast %17 : vector<1x4x16x4xbf16> to vector<4x16x4xbf16>
    %19 = vector.shape_cast %18 : vector<4x16x4xbf16> to vector<64x4xbf16>
    %c1_11 = arith.constant 1 : index
    %c0_12 = arith.constant 0 : index
    %c0_13 = arith.constant 0 : index
    %20 = vector.load %arg4[%c1_11, %c0_12, %c0_13] : memref<9x4x16xbf16, #tpu.memory_space<vmem>>, vector<1x4x16xbf16>
    %21 = vector.shape_cast %20 : vector<1x4x16xbf16> to vector<4x16xbf16>
    %cst_14 = arith.constant dense<0.000000e+00> : vector<64x16xf32>
    %22 = tpu.matmul %19, %21, %cst_14 {dimension_numbers = #tpu.dot_dimension_numbers<[1], [0], [0], [1], [0, 0, 1, 1], [], []>} : vector<64x4xbf16>, vector<4x16xbf16>, vector<64x16xf32> -> vector<64x16xf32>
    %23 = arith.addf %14, %22 : vector<64x16xf32>
    %c0_i32_15 = arith.constant 0 : i32
    %24 = arith.addi %4, %c0_i32_15 : i32
    %c0_16 = arith.constant 0 : index
    %25 = arith.index_cast %24 : i32 to index
    %c2 = arith.constant 2 : index
    %c0_17 = arith.constant 0 : index
    %26 = vector.load %arg3[%c0_16, %25, %c2, %c0_17] : memref<1x18x18x4xbf16, #tpu.memory_space<vmem>>, vector<1x4x16x4xbf16>
    %27 = vector.shape_cast %26 : vector<1x4x16x4xbf16> to vector<4x16x4xbf16>
    %28 = vector.shape_cast %27 : vector<4x16x4xbf16> to vector<64x4xbf16>
    %c2_18 = arith.constant 2 : index
    %c0_19 = arith.constant 0 : index
    %c0_20 = arith.constant 0 : index
    %29 = vector.load %arg4[%c2_18, %c0_19, %c0_20] : memref<9x4x16xbf16, #tpu.memory_space<vmem>>, vector<1x4x16xbf16>
    %30 = vector.shape_cast %29 : vector<1x4x16xbf16> to vector<4x16xbf16>
    %cst_21 = arith.constant dense<0.000000e+00> : vector<64x16xf32>
    %31 = tpu.matmul %28, %30, %cst_21 {dimension_numbers = #tpu.dot_dimension_numbers<[1], [0], [0], [1], [0, 0, 1, 1], [], []>} : vector<64x4xbf16>, vector<4x16xbf16>, vector<64x16xf32> -> vector<64x16xf32>
    %32 = arith.addf %23, %31 : vector<64x16xf32>
    %c1_i32 = arith.constant 1 : i32
    %33 = arith.addi %4, %c1_i32 : i32
    %c0_22 = arith.constant 0 : index
    %34 = arith.index_cast %33 : i32 to index
    %c0_23 = arith.constant 0 : index
    %c0_24 = arith.constant 0 : index
    %35 = vector.load %arg3[%c0_22, %34, %c0_23, %c0_24] : memref<1x18x18x4xbf16, #tpu.memory_space<vmem>>, vector<1x4x16x4xbf16>
    %36 = vector.shape_cast %35 : vector<1x4x16x4xbf16> to vector<4x16x4xbf16>
    %37 = vector.shape_cast %36 : vector<4x16x4xbf16> to vector<64x4xbf16>
    %c3 = arith.constant 3 : index
    %c0_25 = arith.constant 0 : index
    %c0_26 = arith.constant 0 : index
    %38 = vector.load %arg4[%c3, %c0_25, %c0_26] : memref<9x4x16xbf16, #tpu.memory_space<vmem>>, vector<1x4x16xbf16>
    %39 = vector.shape_cast %38 : vector<1x4x16xbf16> to vector<4x16xbf16>
    %cst_27 = arith.constant dense<0.000000e+00> : vector<64x16xf32>
    %40 = tpu.matmul %37, %39, %cst_27 {dimension_numbers = #tpu.dot_dimension_numbers<[1], [0], [0], [1], [0, 0, 1, 1], [], []>} : vector<64x4xbf16>, vector<4x16xbf16>, vector<64x16xf32> -> vector<64x16xf32>
    %41 = arith.addf %32, %40 : vector<64x16xf32>
    %c1_i32_28 = arith.constant 1 : i32
    %42 = arith.addi %4, %c1_i32_28 : i32
    %c0_29 = arith.constant 0 : index
    %43 = arith.index_cast %42 : i32 to index
    %c1_30 = arith.constant 1 : index
    %c0_31 = arith.constant 0 : index
    %44 = vector.load %arg3[%c0_29, %43, %c1_30, %c0_31] : memref<1x18x18x4xbf16, #tpu.memory_space<vmem>>, vector<1x4x16x4xbf16>
    %45 = vector.shape_cast %44 : vector<1x4x16x4xbf16> to vector<4x16x4xbf16>
    %46 = vector.shape_cast %45 : vector<4x16x4xbf16> to vector<64x4xbf16>
    %c4 = arith.constant 4 : index
    %c0_32 = arith.constant 0 : index
    %c0_33 = arith.constant 0 : index
    %47 = vector.load %arg4[%c4, %c0_32, %c0_33] : memref<9x4x16xbf16, #tpu.memory_space<vmem>>, vector<1x4x16xbf16>
    %48 = vector.shape_cast %47 : vector<1x4x16xbf16> to vector<4x16xbf16>
    %cst_34 = arith.constant dense<0.000000e+00> : vector<64x16xf32>
    %49 = tpu.matmul %46, %48, %cst_34 {dimension_numbers = #tpu.dot_dimension_numbers<[1], [0], [0], [1], [0, 0, 1, 1], [], []>} : vector<64x4xbf16>, vector<4x16xbf16>, vector<64x16xf32> -> vector<64x16xf32>
    %50 = arith.addf %41, %49 : vector<64x16xf32>
    %c1_i32_35 = arith.constant 1 : i32
    %51 = arith.addi %4, %c1_i32_35 : i32
    %c0_36 = arith.constant 0 : index
    %52 = arith.index_cast %51 : i32 to index
    %c2_37 = arith.constant 2 : index
    %c0_38 = arith.constant 0 : index
    %53 = vector.load %arg3[%c0_36, %52, %c2_37, %c0_38] : memref<1x18x18x4xbf16, #tpu.memory_space<vmem>>, vector<1x4x16x4xbf16>
    %54 = vector.shape_cast %53 : vector<1x4x16x4xbf16> to vector<4x16x4xbf16>
    %55 = vector.shape_cast %54 : vector<4x16x4xbf16> to vector<64x4xbf16>
    %c5 = arith.constant 5 : index
    %c0_39 = arith.constant 0 : index
    %c0_40 = arith.constant 0 : index
    %56 = vector.load %arg4[%c5, %c0_39, %c0_40] : memref<9x4x16xbf16, #tpu.memory_space<vmem>>, vector<1x4x16xbf16>
    %57 = vector.shape_cast %56 : vector<1x4x16xbf16> to vector<4x16xbf16>
    %cst_41 = arith.constant dense<0.000000e+00> : vector<64x16xf32>
    %58 = tpu.matmul %55, %57, %cst_41 {dimension_numbers = #tpu.dot_dimension_numbers<[1], [0], [0], [1], [0, 0, 1, 1], [], []>} : vector<64x4xbf16>, vector<4x16xbf16>, vector<64x16xf32> -> vector<64x16xf32>
    %59 = arith.addf %50, %58 : vector<64x16xf32>
    %c2_i32 = arith.constant 2 : i32
    %60 = arith.addi %4, %c2_i32 : i32
    %c0_42 = arith.constant 0 : index
    %61 = arith.index_cast %60 : i32 to index
    %c0_43 = arith.constant 0 : index
    %c0_44 = arith.constant 0 : index
    %62 = vector.load %arg3[%c0_42, %61, %c0_43, %c0_44] : memref<1x18x18x4xbf16, #tpu.memory_space<vmem>>, vector<1x4x16x4xbf16>
    %63 = vector.shape_cast %62 : vector<1x4x16x4xbf16> to vector<4x16x4xbf16>
    %64 = vector.shape_cast %63 : vector<4x16x4xbf16> to vector<64x4xbf16>
    %c6 = arith.constant 6 : index
    %c0_45 = arith.constant 0 : index
    %c0_46 = arith.constant 0 : index
    %65 = vector.load %arg4[%c6, %c0_45, %c0_46] : memref<9x4x16xbf16, #tpu.memory_space<vmem>>, vector<1x4x16xbf16>
    %66 = vector.shape_cast %65 : vector<1x4x16xbf16> to vector<4x16xbf16>
    %cst_47 = arith.constant dense<0.000000e+00> : vector<64x16xf32>
    %67 = tpu.matmul %64, %66, %cst_47 {dimension_numbers = #tpu.dot_dimension_numbers<[1], [0], [0], [1], [0, 0, 1, 1], [], []>} : vector<64x4xbf16>, vector<4x16xbf16>, vector<64x16xf32> -> vector<64x16xf32>
    %68 = arith.addf %59, %67 : vector<64x16xf32>
    %c2_i32_48 = arith.constant 2 : i32
    %69 = arith.addi %4, %c2_i32_48 : i32
    %c0_49 = arith.constant 0 : index
    %70 = arith.index_cast %69 : i32 to index
    %c1_50 = arith.constant 1 : index
    %c0_51 = arith.constant 0 : index
    %71 = vector.load %arg3[%c0_49, %70, %c1_50, %c0_51] : memref<1x18x18x4xbf16, #tpu.memory_space<vmem>>, vector<1x4x16x4xbf16>
    %72 = vector.shape_cast %71 : vector<1x4x16x4xbf16> to vector<4x16x4xbf16>
    %73 = vector.shape_cast %72 : vector<4x16x4xbf16> to vector<64x4xbf16>
    %c7 = arith.constant 7 : index
    %c0_52 = arith.constant 0 : index
    %c0_53 = arith.constant 0 : index
    %74 = vector.load %arg4[%c7, %c0_52, %c0_53] : memref<9x4x16xbf16, #tpu.memory_space<vmem>>, vector<1x4x16xbf16>
    %75 = vector.shape_cast %74 : vector<1x4x16xbf16> to vector<4x16xbf16>
    %cst_54 = arith.constant dense<0.000000e+00> : vector<64x16xf32>
    %76 = tpu.matmul %73, %75, %cst_54 {dimension_numbers = #tpu.dot_dimension_numbers<[1], [0], [0], [1], [0, 0, 1, 1], [], []>} : vector<64x4xbf16>, vector<4x16xbf16>, vector<64x16xf32> -> vector<64x16xf32>
    %77 = arith.addf %68, %76 : vector<64x16xf32>
    %c2_i32_55 = arith.constant 2 : i32
    %78 = arith.addi %4, %c2_i32_55 : i32
    %c0_56 = arith.constant 0 : index
    %79 = arith.index_cast %78 : i32 to index
    %c2_57 = arith.constant 2 : index
    %c0_58 = arith.constant 0 : index
    %80 = vector.load %arg3[%c0_56, %79, %c2_57, %c0_58] : memref<1x18x18x4xbf16, #tpu.memory_space<vmem>>, vector<1x4x16x4xbf16>
    %81 = vector.shape_cast %80 : vector<1x4x16x4xbf16> to vector<4x16x4xbf16>
    %82 = vector.shape_cast %81 : vector<4x16x4xbf16> to vector<64x4xbf16>
    %c8 = arith.constant 8 : index
    %c0_59 = arith.constant 0 : index
    %c0_60 = arith.constant 0 : index
    %83 = vector.load %arg4[%c8, %c0_59, %c0_60] : memref<9x4x16xbf16, #tpu.memory_space<vmem>>, vector<1x4x16xbf16>
    %84 = vector.shape_cast %83 : vector<1x4x16xbf16> to vector<4x16xbf16>
    %cst_61 = arith.constant dense<0.000000e+00> : vector<64x16xf32>
    %85 = tpu.matmul %82, %84, %cst_61 {dimension_numbers = #tpu.dot_dimension_numbers<[1], [0], [0], [1], [0, 0, 1, 1], [], []>} : vector<64x4xbf16>, vector<4x16xbf16>, vector<64x16xf32> -> vector<64x16xf32>
    %86 = arith.addf %77, %85 : vector<64x16xf32>
    %87 = arith.truncf %86 : vector<64x16xf32> to vector<64x16xbf16>
    %c0_62 = arith.constant 0 : index
    %c0_63 = arith.constant 0 : index
    %c0_64 = arith.constant 0 : index
    %88 = vector.load %arg5[%c0_62, %c0_63, %c0_64] : memref<1x64x16xbf16, #tpu.memory_space<vmem>>, vector<1x64x16xbf16>
    %89 = vector.shape_cast %88 : vector<1x64x16xbf16> to vector<64x16xbf16>
    %90 = vector.shape_cast %87 : vector<64x16xbf16> to vector<1x64x16xbf16>
    tpu.vector_store %arg5[%c0_62, %c0_63, %c0_64], %90 {strides = array<i32>} : memref<1x64x16xbf16, #tpu.memory_space<vmem>>, vector<1x64x16xbf16>,
    %c0_65 = arith.constant 0 : index
    %c0_66 = arith.constant 0 : index
    %c0_67 = arith.constant 0 : index
    %91 = vector.load %arg6[%c0_65, %c0_66, %c0_67] : memref<1x1x16xf32, #tpu.memory_space<vmem>>, vector<1x1x16xf32>
    %92 = vector.shape_cast %91 : vector<1x1x16xf32> to vector<1x16xf32>
    %cst_68 = arith.constant dense<0.000000e+00> : vector<16xf32>
    %93 = vector.multi_reduction <add>, %86, %cst_68 [0] : vector<64x16xf32> to vector<16xf32>
    %94 = vector.shape_cast %93 : vector<16xf32> to vector<1x16xf32>
    %95 = arith.addf %92, %94 : vector<1x16xf32>
    %c0_69 = arith.constant 0 : index
    %c0_70 = arith.constant 0 : index
    %c0_71 = arith.constant 0 : index
    %96 = vector.load %arg6[%c0_69, %c0_70, %c0_71] : memref<1x1x16xf32, #tpu.memory_space<vmem>>, vector<1x1x16xf32>
    %97 = vector.shape_cast %96 : vector<1x1x16xf32> to vector<1x16xf32>
    %98 = vector.shape_cast %95 : vector<1x16xf32> to vector<1x1x16xf32>
    tpu.vector_store %arg6[%c0_69, %c0_70, %c0_71], %98 {strides = array<i32>} : memref<1x1x16xf32, #tpu.memory_space<vmem>>, vector<1x1x16xf32>,
    %c0_72 = arith.constant 0 : index
    %c0_73 = arith.constant 0 : index
    %c0_74 = arith.constant 0 : index
    %99 = vector.load %arg7[%c0_72, %c0_73, %c0_74] : memref<1x1x16xf32, #tpu.memory_space<vmem>>, vector<1x1x16xf32>
    %100 = vector.shape_cast %99 : vector<1x1x16xf32> to vector<1x16xf32>
    %101 = arith.mulf %86, %86 : vector<64x16xf32>
    %cst_75 = arith.constant dense<0.000000e+00> : vector<16xf32>
    %102 = vector.multi_reduction <add>, %101, %cst_75 [0] : vector<64x16xf32> to vector<16xf32>
    %103 = vector.shape_cast %102 : vector<16xf32> to vector<1x16xf32>
    %104 = arith.addf %100, %103 : vector<1x16xf32>
    %c0_76 = arith.constant 0 : index
    %c0_77 = arith.constant 0 : index
    %c0_78 = arith.constant 0 : index
    %105 = vector.load %arg7[%c0_76, %c0_77, %c0_78] : memref<1x1x16xf32, #tpu.memory_space<vmem>>, vector<1x1x16xf32>
    %106 = vector.shape_cast %105 : vector<1x1x16xf32> to vector<1x16xf32>
    %107 = vector.shape_cast %104 : vector<1x16xf32> to vector<1x1x16xf32>
    tpu.vector_store %arg7[%c0_76, %c0_77, %c0_78], %107 {strides = array<i32>} : memref<1x1x16xf32, #tpu.memory_space<vmem>>, vector<1x1x16xf32>,
    return
  }
  func.func @transform_0(%arg0: i32, %arg1: i32, %arg2: i32) -> (i32, i32, i32, i32) {
    %c0_i32 = arith.constant 0 : i32
    %c0_i32_0 = arith.constant 0 : i32
    %c0_i32_1 = arith.constant 0 : i32
    %c0_i32_2 = arith.constant 0 : i32
    return %arg0, %c0_i32, %c0_i32_0, %c0_i32_1 : i32, i32, i32, i32
  }
  func.func @transform_1(%arg0: i32, %arg1: i32, %arg2: i32) -> (i32, i32, i32) {
    %c0_i32 = arith.constant 0 : i32
    %c0_i32_0 = arith.constant 0 : i32
    %c0_i32_1 = arith.constant 0 : i32
    return %c0_i32, %c0_i32_0, %arg1 : i32, i32, i32
  }
  func.func @transform_2(%arg0: i32, %arg1: i32, %arg2: i32) -> (i32, i32, i32) {
    %c0_i32 = arith.constant 0 : i32
    return %arg0, %arg2, %arg1 : i32, i32, i32
  }
  func.func @transform_3(%arg0: i32, %arg1: i32, %arg2: i32) -> (i32, i32, i32) {
    %c0_i32 = arith.constant 0 : i32
    %c0_i32_0 = arith.constant 0 : i32
    return %arg0, %c0_i32, %arg1 : i32, i32, i32
  }
  func.func @transform_4(%arg0: i32, %arg1: i32, %arg2: i32) -> (i32, i32, i32) {
    %c0_i32 = arith.constant 0 : i32
    %c0_i32_0 = arith.constant 0 : i32
    return %arg0, %c0_i32, %arg1 : i32, i32, i32
  }
}

</mosaic_0001>

<bundles_post_ra>
// kernel: tpu_custom_call.1
= control target key start
LH: loop header
LB: loop body
LE: loop exit
PB: predicated region body
PF: predicated region fallthrough
CT: control target
= control target key end

     0   :  { %10 = vsyncpa [#allocation3], 0  ;;  %s3316_s0 = inlined_call_operand.vmem [shape: bf16[2,18,18,4], index: 0, kind: input, shape index: {}]   ;;  %s3317_s1 = inlined_call_operand.vmem [shape: bf16[9,4,16], index: 1, kind: input, shape index: {}]   ;;  %s3318_s2 = inlined_call_operand.vmem [shape: bf16[2,256,16], index: 2, kind: output, shape index: {0}]   ;;  %s3319_s3 = inlined_call_operand.hbm [shape: f32[2,1,16], index: 3, kind: output, shape index: {1}]   ;;  %s3320_s4 = inlined_call_operand.hbm [shape: f32[2,1,16], index: 4, kind: output, shape index: {2}]  }
   0x1   :  { %12 = vsyncpa [#allocation3 + $0x1], 0 }
   0x2   :  { %13 = vsyncpa [#allocation5], 0 }
   0x3   :  { %15 = vsyncpa [#allocation5 + $0x1], 0  ;;  %s2648_s15 = smov 0   ;;  %s2650_s16 = smov 0  }
   0x4   :  { %s2652_s17 = smov 0   ;;  %s2654_s18 = smov 0  }
   0x5   :  { %s2656_s19 = smov 0   ;;  %s2658_s20 = smov 0  }
   0x6   :  { %s2660_s21 = smov 0   ;;  %s2662_s22 = smov 0  }
   0x7 LB: > { %s2012_s23 = sadd.s32 4294967295, %s2618_s22   ;;  %s2013_s24 = sadd.s32 4294967294, %s2618_s22   ;;  %s2618_s22 = sphi %s2662_s22, %s21_s22   ;;  %s2614_s21 = sphi %s2660_s21, %s3338_s21   ;;  %s2610_s20 = sphi %s2658_s20, %s3337_s20   ;;  %s2606_s19 = sphi %s2656_s19, %s3336_s19   ;;  %s2602_s18 = sphi %s2654_s18, %s3335_s18   ;;  %s2598_s17 = sphi %s2652_s17, %s3334_s17   ;;  %s2594_s16 = sphi %s2650_s16, %s3333_s16   ;;  %s2590_s15 = sphi %s2648_s15, %s3332_s15  }
   0x8   : > { %s33_s25 = sadd.s32 1, %s2610_s20  ;;  %s40_s26 = sadd.s32 1, %s2614_s21 }
   0x9   : > { %p34_p0 = scmp.ge.s32.totalorder %s33_s25, 4  ;;  %p141_p1 = scmp.ne.s32.totalorder %s2598_s17, %s2594_s16 }
   0xa   : > { %p142_p2 = scmp.eq.s32.totalorder %s2012_s23, 7  ;;  %p147_p4 = scmp.ne.s32.totalorder %s2594_s16, %s2590_s15 }
   0xb   : > { %s3340_s25 = smov (%p34_p0, %s33_s25), 0  ;;  %s3342_s26 = smov (!%p34_p0, %s40_s26), %s2614_s21 }
   0xc   : > { %3322 = sst [smem:[#allocation8_spill]] %s3340_s25  ;;  %p2697_p3 = por %p142_p2, %p141_p1 }
   0xd   : > { %p42_p5 = scmp.ge.s32.totalorder %s3342_s26, 2  ;;  %p148_p6 = scmp.eq.s32.totalorder %s2013_s24, 7 }
   0xe   : > { %p2017_p7 = scmp.ge.s32.totalorder %s2618_s22, 1  ;;  %p209_p8 = scmp.lt.s32.totalorder %s2618_s22, 9 }
   0xf   : > { %s3344_s26 = smov (%p42_p5, %s3342_s26), 0  ;;  %p2707_p9 = por %p148_p6, %p147_p4 }
  0x10   : > { %3324 = sst [smem:[#allocation9_spill]] %s3344_s26  ;;  %p210_p10 = pnand %p2017_p7, %p209_p8 }
  0x11   : > { %s126_s29 = ssub.s32 %s2614_s21, %s3344_s26  ;;  %s131_s30 = sadd.s32 1, %s2598_s17 }
  0x12   : > { %p129_p11 = scmp.eq.s32.totalorder %s126_s29, 0  ;;  %213 = sbr.rel (%p210_p10) target bundleno = 406 (0x196), region = 28 }
  0x13   : > { %s2718_s6 = sand.u32 (!%p210_p10), 1, %s2594_s16   ;;  %p254_p12 = scmp.lt.s32.totalorder (!%p210_p10), %s2606_s19, 1 }
  0x14   : > { %s2715_s5 = scalar_select %p129_p11, %s2598_s17, %s131_s30  }
  0x15   : > { %s2019_s8 = sshll.u32 (!%p210_p10), %s2602_s18, 3  ;;  %s2732_s26 = scalar_lea.vmem (!%p210_p10), [#allocation2], %s2718_s6 }
  0x16   : > { %p266_p13 = scmp.lt.s32.totalorder (!%p210_p10), %s2019_s8, 31  ;;  %s2735_s25 = scalar_lea.vmem (!%p210_p10), [#allocation4], %s2718_s6 }
  0x17   : > { %p2022_p0 = scmp.ne.s32.totalorder (!%p210_p10), %s2602_s18, 0 }
  0x19   : > { %s255_s7 = scalar_select %p254_p12, %s2606_s19, 1 }
  0x1a   : > { %s3346_s8 = smov (!%p266_p13, %s2019_s8), 31  ;;  %280 = sbr.rel (%p2022_p0) target bundleno = 33 (0x21), region = 32 }
  0x1b   : > { %s2402_s9 = smul.u32 216, %s255_s7  ;;  %s2020_s13 = sshll.u32 %s255_s7, 5  ;;  %vm281_vm0 = vcmask (!%p2022_p0), 122880   ;;  %v2620_v0 = vmov (!%p2022_p0), 0.0  }
  0x1c   : > { %s272_s14 = sadd.s32 %s2020_s13, %s3346_s8  ;;  %282 = vst.msk [vmem:[%s2732_s26] sm:$0x1] (!%p2022_p0), %vm281_vm0, %v2620_v0  ;;  %283 = vst.msk [vmem:[%s2735_s25] sm:$0x1] (!%p2022_p0), %vm281_vm0, %v2620_v0 }
  0x1d   : > { %s258_s12 = scalar_lea.vmem %s3316_s0, %s2402_s9  ;;  %s2021_s23 = sshll.u32 %s272_s14, 2 }
  0x1e   : > { %s2729_s30 = scalar_lea.vmem %s3318_s2, %s2021_s23 }
  0x21 PF: > { %v2026_v1 = vld [vmem:[%s3317_s1 + $0x2] sm:$0x3]  ;;  %vm427_vm1 = vcmask 1041408   ;;  %v2746_v2 = vld [vmem:[%s3317_s1 + $0x8] sm:$0x3]  ;;  %s2182_s11 = smul.u32 48, %s2602_s18 }
  0x22   : > { %2392 = vmatprep.subr.msk.bf16.mxu1 %vm427_vm1, %v2026_v1  ;;  %2396 = vmatprep.subr.msk.bf16.mxu0 %vm427_vm1, %v2746_v2  ;;  %v429_v3 = vsel %vm427_vm1, %v2026_v1, 0  ;;  %v2755_v4 = vsel %vm427_vm1, %v2746_v2, 0  ;;  %vm301_vm2 = vsmask.f32 3328  ;;  %vm302_vm3 = vsmask.f32 7440 }
  0x23   : > { %2237 = vmatpush3.bf16.msra.mxu1 %v429_v3  ;;  %2277 = vmatpush3.bf16.msra.mxu0 %v2755_v4  ;;  %s2758_s13 = scalar_lea.vmem %s258_s12, %s2182_s11  ;;  %v2763_v5 = vld [vmem:[%s3317_s1] sm:$0x3]  ;;  %v2768_v6 = vld [vmem:[%s3317_s1 + $0xa] sm:$0x3]  ;;  %vm2803_vm4 = vmor %vm301_vm2, %vm302_vm3  ;;  %vm414_vm5 = vcmask 31744   ;;  %vm608_vm6 = vcmask 1042432  }
  0x24   : > { %v2771_v7 = vld [vmem:[%s2758_s13] sm:$0xf]  ;;  %v2774_v8 = vld [vmem:[%s2758_s13 + $0x4] sm:$0xf]  ;;  %v2777_v9 = vld [vmem:[%s2758_s13 + $0x8] sm:$0x1]  ;;  %2393 = vmatprep.subr.msk.bf16.mxu1 %vm427_vm1, %v2763_v5  ;;  %2398 = vmatprep.subr.msk.bf16.mxu0 %vm427_vm1, %v2768_v6 }
  0x25   : > { %v305_v10 = vshrl.u32 %v2771_v7, 16  ;;  %v308_v11 = vshll.u32 %v2771_v7, 16  ;;  %v314_v12 = vshll.u32 %v2774_v8, 16  ;;  %v318_v13 = vshrl.u32 %v2774_v8, 16  ;;  %v2075_v14 = vld [vmem:[%s2758_s13 + $0xc] sm:$0xf] }
  0x26   : > { %v324_v15 = vshll.u32 %v2777_v9, 16  ;;  %v2790_v16 = vld [vmem:[%s2758_s13 + $0x10] sm:$0xf]  ;;  %v2793_v17 = vld [vmem:[%s2758_s13 + $0x14] sm:$0x1]  ;;  %v876_v23 = vshrl.u32 %v2075_v14, 16 }
  0x27   : > { %v307_v18 = vrot.slane %v305_v10, 4  ;;  %v310_v19 = vrot.slane %v308_v11, 5  ;;  %v316_v20 = vrot.slane %v314_v12, 5  ;;  %v320_v21 = vrot.slane %v318_v13, 4  ;;  %v2799_v30 = vld [vmem:[%s2758_s13 + $0xc] sm:$0xf] }
  0x28   : > { %v326_v22 = vrot.slane %v324_v15, 5  ;;  %v879_v24 = vshll.u32 %v2075_v14, 16  ;;  %v885_v25 = vshll.u32 %v2790_v16, 16  ;;  %v889_v28 = vshrl.u32 %v2790_v16, 16  ;;  %v2808_v35 = vld [vmem:[%s2758_s13 + $0x10] sm:$0xf] }
  0x29   : > { %v311_v26 = vor.u32 %v310_v19, %v307_v18  ;;  %v321_v27 = vor.u32 %v320_v21, %v316_v20  ;;  %v895_v29 = vshll.u32 %v2793_v17, 16  ;;  %v878_v32 = vrot.slane %v876_v23, 4  ;;  %v2811_v41 = vld [vmem:[%s2758_s13 + $0x14] sm:$0x1]  ;;  %v2078_v56 = vld [vmem:[%s2758_s13 + $0x18] sm:$0xf] }
  0x2a   : > { %v881_v33 = vrot.slane %v879_v24, 5  ;;  %v887_v34 = vrot.slane %v885_v25, 5  ;;  %v891_v38 = vrot.slane %v889_v28, 4  ;;  %v329_v42 = vshrl.u32 %v2799_v30, 16  ;;  %v2829_v61 = vld [vmem:[%s2758_s13 + $0x1c] sm:$0xf] }
  0x2b   : > { %v312_v36 = vrot.slane %v311_v26, 4  ;;  %v322_v37 = vrot.slane %v321_v27, 4  ;;  %v897_v40 = vrot.slane %v895_v29, 5  ;;  %v332_v43 = vshll.u32 %v2799_v30, 16  ;;  %v2832_v62 = vld [vmem:[%s2758_s13 + $0x20] sm:$0x1] }
  0x2c   : > { %v882_v39 = vor.u32 %v881_v33, %v878_v32  ;;  %v892_v46 = vor.u32 %v891_v38, %v887_v34  ;;  %v338_v47 = vshll.u32 %v2808_v35, 16  ;;  %v331_v50 = vrot.slane %v329_v42, 4  ;;  %v2849_v24 = vld [vmem:[%s2758_s13 + $0x1c] sm:$0xf]  ;;  %v2854_v33 = vld [vmem:[%s2758_s13 + $0x20] sm:$0x1] }
  0x2d   : > { %v317_v44 = vsel %vm2803_vm4, %v312_v36, %v316_v20  ;;  %v327_v45 = vsel %vm2803_vm4, %v322_v37, %v326_v22  ;;  %v334_v51 = vrot.slane %v332_v43, 5  ;;  %v342_v54 = vshrl.u32 %v2808_v35, 16  ;;  %v2842_v20 = vld [vmem:[%s2758_s13 + $0x18] sm:$0xf]  ;;  %v2863_v42 = vld [vmem:[%s2758_s13 + $0x24] sm:$0xf] }
  0x2e   : > { %v2027_v48 = vcombine.low %v317_v44, %v327_v45  ;;  %v883_v49 = vrot.slane %v882_v39, 4  ;;  %v893_v52 = vrot.slane %v892_v46, 4  ;;  %v340_v53 = vrot.slane %v338_v47, 5  ;;  %v2866_v43 = vld [vmem:[%s2758_s13 + $0x28] sm:$0xf]  ;;  %s1844_s24 = sshll.u32 %s2735_s25, 4  ;;  %s3240_s24 = int_to_ptr.vmem [resolvable:$true] %s1844_s24 }
  0x2f   : > { %v348_v55 = vshll.u32 %v2811_v41, 16  ;;  %v1091_v58 = vrot.slane %v2790_v16, 5  ;;  %v1094_v59 = vrot.slane %v2793_v17, 5  ;;  %v335_v60 = vor.u32 %v334_v51, %v331_v50  ;;  %v2869_v47 = vld [vmem:[%s2758_s13 + $0x2c] sm:$0x1]  ;;  %s1809_s10 = scalar_lea.sflag [#allocation3], %s2718_s6 }
  0x30   : > { %2238 = vmatprep.mubr.msk.bf16.mxu1 %vm414_vm5, %v2027_v48  ;;  %v888_v57 = vsel %vm2803_vm4, %v883_v49, %v887_v34  ;;  %v898_v63 = vsel %vm2803_vm4, %v893_v52, %v897_v40  ;;  %v344_v0 = vrot.slane %v342_v54, 4  ;;  %v529_v3 = vsel %vm427_vm1, %v2763_v5, 0  ;;  %v2874_v48 = vld [vmem:[%s3317_s1 + $0x4] sm:$0x3]  ;;  %v2921_v16 = vld [vmem:[%s2758_s13 + $0x2c] sm:$0x1] }
  0x31   : > { %v350_v1 = vrot.slane %v348_v55, 5  ;;  %v2088_v10 = vcombine.low %v888_v57, %v898_v63  ;;  %v336_v11 = vrot.slane %v335_v60, 4  ;;  %v900_v12 = vshrl.u32 %v2078_v56, 16  ;;  %v2096_v57 = vld [vmem:[%s2758_s13 + $0xc] sm:$0xe]  ;;  %s2621_s18 = smov [#allocation2]  }
  0x32   : > { %v903_v13 = vshll.u32 %v2078_v56, 16  ;;  %v345_v14 = vor.u32 %v344_v0, %v340_v53  ;;  %v909_v15 = vshll.u32 %v2829_v61, 16  ;;  %v913_v18 = vshrl.u32 %v2829_v61, 16  ;;  %s2496_s14 = sshll.u32 %s2621_s18, 4  ;;  %s2497_s14 = int_to_ptr.vmem [resolvable:$false] %s2496_s14 }
  0x33   : > { %v919_v19 = vshll.u32 %v2832_v62, 16  ;;  %2278 = vmatprep.mubr.msk.bf16.mxu0 %vm414_vm5, %v2088_v10  ;;  %v341_v21 = vsel %vm2803_vm4, %v336_v11, %v340_v53  ;;  %v902_v5 = vrot.slane %v900_v12, 4  ;;  %v1101_v23 = vrot.slane %v2832_v62, 5  ;;  %s2498_s23 = scalar_lea.vmem %s2497_s14, 32 }
  0x34   : > { %v905_v22 = vrot.slane %v903_v13, 5  ;;  %v346_v25 = vrot.slane %v345_v14, 4  ;;  %v911_v26 = vrot.slane %v909_v15, 5  ;;  %v915_v27 = vrot.slane %v913_v18, 4  ;;  %v2123_v14 = vld [vmem:[%s3317_s1 + $0xc] sm:$0x3] }
  0x35   : > { %v921_v28 = vrot.slane %v919_v19, 5  ;;  %v1144_v32 = vsel %vm427_vm1, %v2768_v6, 0  ;;  %v353_v34 = vshrl.u32 %v2842_v20, 16  ;;  %v356_v36 = vshll.u32 %v2842_v20, 16 }
  0x36   : > { %v906_v29 = vor.u32 %v905_v22, %v902_v5  ;;  %v351_v37 = vsel %vm2803_vm4, %v346_v25, %v350_v1  ;;  %v916_v38 = vor.u32 %v915_v27, %v911_v26  ;;  %v362_v39 = vshll.u32 %v2849_v24, 16 }
  0x37   : > { %v366_v40 = vshrl.u32 %v2849_v24, 16  ;;  %v2028_v6 = vcombine.low %v341_v21, %v351_v37  ;;  %v355_v45 = vrot.slane %v353_v34, 4  ;;  %v358_v46 = vrot.slane %v356_v36, 5  ;;  %v2097_v21 = vld [vmem:[%s2758_s13 + $0x18] sm:$0xe] }
  0x38   : > { %v907_v44 = vrot.slane %v906_v29, 4  ;;  %v917_v49 = vrot.slane %v916_v38, 4  ;;  %v364_v50 = vrot.slane %v362_v39, 5  ;;  %v372_v52 = vshll.u32 %v2854_v33, 16  ;;  %v2098_v34 = vld [vmem:[%s2758_s13 + $0x24] sm:$0xe] }
  0x39   : > { %v368_v51 = vrot.slane %v366_v40, 4  ;;  %2239 = vmatmul.mubr.msk.bf16.vlgmr.msra.gmra.mrb[0].mxu1 %vm414_vm5, %v2028_v6  ;;  %v359_v54 = vor.u32 %v358_v46, %v355_v45  ;;  %v377_v55 = vshrl.u32 %v2863_v42, 16  ;;  %v380_v56 = vshll.u32 %v2863_v42, 16  ;;  %v2918_v45 = vld [vmem:[%s2758_s13 + $0x28] sm:$0xf] }
  0x3a   : > { %v912_v53 = vsel %vm2803_vm4, %v907_v44, %v911_v26  ;;  %2247 = vmatpush3.bf16.msra.mxu1 %v529_v3  ;;  %v922_v60 = vsel %vm2803_vm4, %v917_v49, %v921_v28  ;;  %v374_v0 = vrot.slane %v372_v52, 5  ;;  %v386_v1 = vshll.u32 %v2866_v43, 16  ;;  %v2932_v52 = vld [vmem:[%s2758_s13 + $0x34] sm:$0xf] }
  0x3b   : > { %v369_v63 = vor.u32 %v368_v51, %v364_v50  ;;  %v2089_v10 = vcombine.low %v912_v53, %v922_v60  ;;  %v360_v11 = vrot.slane %v359_v54, 4  ;;  %v379_v12 = vrot.slane %v377_v55, 4  ;;  %2394 = vmatprep.subr.msk.bf16.mxu1 %vm427_vm1, %v2874_v48  ;;  %v2099_v53 = vld [vmem:[%s2758_s13 + $0x30] sm:$0xe]  ;;  %v2945_v60 = vld [vmem:[%s2758_s13 + $0x38] sm:$0x1] }
  0x3c   : > { %v382_v13 = vrot.slane %v380_v56, 5  ;;  %v388_v15 = vrot.slane %v386_v1, 5  ;;  %v390_v18 = vshrl.u32 %v2866_v43, 16  ;;  %v396_v19 = vshll.u32 %v2869_v47, 16 }
  0x3d   : > { %v370_v3 = vrot.slane %v369_v63, 4  ;;  %2279 = vmatmul.mubr.msk.bf16.vlgmr.msra.gmra.mrb[0].mxu0 %vm414_vm5, %v2089_v10  ;;  %v365_v5 = vsel %vm2803_vm4, %v360_v11, %v364_v50  ;;  %vm609_vm7 = vcmask 1046532   ;;  %v2100_v25 = vrot.slane %v2096_v57, 9  ;;  %v596_v11 = vld [vmem:[%s2758_s13] sm:$0xe] }
  0x3e   : > { %v383_v22 = vor.u32 %v382_v13, %v379_v12  ;;  %2287 = vmatpush3.bf16.msra.mxu0 %v1144_v32  ;;  %v392_v27 = vrot.slane %v390_v18, 4  ;;  %vm2900_vm8 = vmor %vm608_vm6, %vm609_vm7  ;;  %v1093_v29 = vrot.slane %v1091_v58, 4  ;;  %v2101_v38 = vrot.slane %v2097_v21, 9 }
  0x3f   : > { %v375_v26 = vsel %vm2803_vm4, %v370_v3, %v374_v0  ;;  %v1092_v32 = vsel %vm2900_vm8, %v2100_v25, %v1091_v58  ;;  %2399 = vmatprep.subr.msk.bf16.mxu0 %vm427_vm1, %v2123_v14  ;;  %v398_v40 = vrot.slane %v396_v19, 5  ;;  %v1098_v44 = vrot.slane %v2829_v61, 5  ;;  %v597_v3 = vld [vmem:[%s2758_s13 + $0xc] sm:$0xe] }
  0x40   : > { %v2029_v36 = vcombine.low %v365_v5, %v375_v26  ;;  %v384_v37 = vrot.slane %v383_v22, 4  ;;  %v393_v39 = vor.u32 %v392_v27, %v388_v15  ;;  %v1095_v6 = vsel %vm2900_vm8, %v1093_v29, %v1094_v59  ;;  %v2144_v19 = vld [vmem:[%s3317_s1 + $0xe] sm:$0x3] }
  0x41   : > { %v2105_v46 = vcombine.low %v1092_v32, %v1095_v6  ;;  %v1099_v17 = vsel %vm2900_vm8, %v2101_v38, %v1098_v44  ;;  %v1100_v50 = vrot.slane %v1098_v44, 4  ;;  %v2102_v59 = vrot.slane %v2098_v34, 9  ;;  %v2132_v32 = vld [vmem:[%s2758_s13 + $0x18] sm:$0xf]  ;;  %v2991_v6 = vld [vmem:[%s2758_s13 + $0x20] sm:$0x1] }
  0x42   : > { %2242 = vmatprep.mubr.msk.bf16.mxu1 %vm414_vm5, %v2029_v36  ;;  %v389_v58 = vsel %vm2803_vm4, %v384_v37, %v388_v15  ;;  %v394_v49 = vrot.slane %v393_v39, 4  ;;  %v1105_v61 = vrot.slane %v2918_v45, 5  ;;  %v1108_v51 = vrot.slane %v2921_v16, 5  ;;  %v2980_v37 = vld [vmem:[%s2758_s13 + $0x24] sm:$0xe] }
  0x43   : > { %2288 = vmatprep.mubr.msk.bf16.mxu0 %vm414_vm5, %v2105_v46  ;;  %v620_v54 = vrot.slane %v2808_v35, 5  ;;  %v1102_v56 = vsel %vm2900_vm8, %v1100_v50, %v1101_v23  ;;  %v2035_v57 = vcombine.low %v2771_v7, %v2774_v8  ;;  %v2103_v12 = vrot.slane %v2099_v53, 9 }
  0x44   : > { %v399_v55 = vsel %vm2803_vm4, %v394_v49, %v398_v40  ;;  %v2106_v0 = vcombine.low %v1099_v17, %v1102_v56  ;;  %v1106_v1 = vsel %vm2900_vm8, %v2102_v59, %v1105_v61  ;;  %v1107_v10 = vrot.slane %v1105_v61, 4  ;;  %v2988_v40 = vld [vmem:[%s2758_s13 + $0x1c] sm:$0xf]  ;;  %v3023_v56 = vld [vmem:[%s2758_s13 + $0x28] sm:$0xf] }
  0x45   : > { %v2030_v63 = vcombine.low %v389_v58, %v399_v55  ;;  %v1112_v13 = vrot.slane %v2932_v52, 5  ;;  %v1266_v62 = vsel %vm427_vm1, %v2123_v14, 0  ;;  %v1115_v23 = vrot.slane %v2945_v60, 5 }
  0x46   : > { %v1109_v7 = vsel %vm2900_vm8, %v1107_v10, %v1108_v51  ;;  %v616_v21 = vrot.slane %v2777_v9, 5  ;;  %v623_v5 = vrot.slane %v2811_v41, 5  ;;  %v613_v14 = vrot.slane %v2774_v8, 5  ;;  %v2066_v41 = vld [vmem:[%s3317_s1 + $0x6] sm:$0x3] }
  0x47   : > { %2243 = vmatmul.mubr.msk.bf16.gmra.mrb[4].mxu1 %vm414_vm5, %v2030_v63  ;;  %v2107_v15 = vcombine.low %v1106_v1, %v1109_v7  ;;  %v1114_v18 = vrot.slane %v1112_v13, 4  ;;  %v2044_v22 = vrot.slane %v597_v3, 9  ;;  %v1113_v25 = vsel %vm2900_vm8, %v2103_v12, %v1112_v13  ;;  %v598_v8 = vld [vmem:[%s2758_s13 + $0x18] sm:$0xe]  ;;  %v2135_v51 = vld [vmem:[%s2758_s13 + $0x24] sm:$0xf] }
  0x48   : > { %2248 = vmatprep.mubr.msk.bf16.mxu1 %vm414_vm5, %v2035_v57  ;;  %v2043_v26 = vrot.slane %v596_v11, 9  ;;  %v622_v27 = vrot.slane %v620_v54, 4  ;;  %v2036_v29 = vcombine.low %v2799_v30, %v2808_v35  ;;  %v666_v34 = vsel %vm427_vm1, %v2874_v48, 0  ;;  %v2485_v13 = vld [vmem:[%s2758_s13 + $0x24] sm:$0xff]  }
  0x49   : > { %2289 = vmatmul.mubr.msk.bf16.vlgmr.msra.gmra.mrb[0].mxu0 %vm414_vm5, %v2106_v0  ;;  %v1116_v9 = vsel %vm2900_vm8, %v1114_v18, %v1115_v23  ;;  %v615_v36 = vrot.slane %v613_v14, 4  ;;  %v2037_v38 = vcombine.low %v2842_v20, %v2849_v24  ;;  %v2038_v39 = vcombine.low %v2863_v42, %v2866_v43  ;;  %v2484_v20 = vld [vmem:[%s2758_s13 + $0x18] sm:$0xff]   ;;  %v2138_v23 = vld [vmem:[%s2758_s13 + $0x30] sm:$0xf] }
  0x4a   : > { %2297 = vmatpush3.bf16.msra.mxu0 %v1266_v62  ;;  %2292 = vmatprep.mubr.msk.bf16.mxu0 %vm414_vm5, %v2107_v15  ;;  %v2108_v30 = vcombine.low %v1113_v25, %v1116_v9  ;;  %v2994_v35 = vsel %vm427_vm1, %v2144_v19, 0  ;;  %v2998_v48 = vsel %vm2900_vm8, %v2044_v22, %v620_v54  ;;  %v3002_v44 = vsel %vm2900_vm8, %v622_v27, %v623_v5  ;;  %v2486_v15 = vld [vmem:[%s2758_s13 + $0x30] sm:$0xff]   ;;  %v3044_v25 = vld [vmem:[%s2758_s13 + $0x2c] sm:$0x1] }
  0x4b   : > { %2400 = vmatprep.subr.msk.bf16.mxu0 %vm427_vm1, %v2144_v19  ;;  %v614_v42 = vsel %vm2900_vm8, %v2043_v26, %v613_v14  ;;  %v3008_v58 = vsel %vm427_vm1, %v2066_v41, 0  ;;  %v2045_v46 = vrot.slane %v598_v8, 9  ;;  %v627_v49 = vrot.slane %v2849_v24, 5  ;;  %v3041_v14 = vld [vmem:[%s2758_s13 + $0x34] sm:$0xf] }
  0x4c   : > { %v617_v17 = vsel %vm2900_vm8, %v615_v36, %v616_v21  ;;  %v630_v50 = vrot.slane %v2854_v33, 5  ;;  %v1354_v59 = vshrl.u32 %v2132_v32, 16  ;;  %v1357_v61 = vshll.u32 %v2132_v32, 16 }
  0x4d   : > { %v2049_v53 = vcombine.low %v2998_v48, %v3002_v44  ;;  %v2046_v54 = vrot.slane %v2980_v37, 9  ;;  %v1363_v24 = vshll.u32 %v2988_v40, 16  ;;  %v1367_v55 = vshrl.u32 %v2988_v40, 16 }
  0x4e   : > { %v634_v33 = vrot.slane %v2866_v43, 5  ;;  %v1356_v57 = vrot.slane %v1354_v59, 4  ;;  %v1359_v63 = vrot.slane %v1357_v61, 5  ;;  %v1373_v0 = vshll.u32 %v2991_v6, 16 }
  0x4f   : > { %2249 = vmatmul.mubr.msk.bf16.vlgmr.msra.gmra.mrb[0].mxu1 %vm414_vm5, %v2036_v29  ;;  %v2048_v1 = vcombine.low %v614_v42, %v617_v17  ;;  %v3032_v10 = vsel %vm2900_vm8, %v2045_v46, %v627_v49  ;;  %v1365_v11 = vrot.slane %v1363_v24, 5  ;;  %v1369_v12 = vrot.slane %v1367_v55, 4 }
  0x50   : > { %2257 = vmatpush3.bf16.msra.mxu1 %v666_v34  ;;  %2252 = vmatprep.mubr.msk.bf16.mxu1 %vm414_vm5, %v2037_v38  ;;  %v1360_v3 = vor.u32 %v1359_v63, %v1356_v57  ;;  %v1378_v62 = vshrl.u32 %v2135_v51, 16  ;;  %v1381_v7 = vshll.u32 %v2135_v51, 16  ;;  %v1387_v43 = vshll.u32 %v3023_v56, 16  ;;  %v3054_v34 = vld [vmem:[%s2758_s13 + $0x38] sm:$0x1] }
  0x51   : > { %2293 = vmatmul.mubr.msk.bf16.gmra.mrb[4].mxu0 %vm414_vm5, %v2108_v30  ;;  %2395 = vmatprep.subr.msk.bf16.mxu1 %vm427_vm1, %v2066_v41  ;;  %v629_v18 = vrot.slane %v627_v49, 4  ;;  %v637_v19 = vrot.slane %v2869_v47, 5  ;;  %v1370_v21 = vor.u32 %v1369_v12, %v1365_v11  ;;  %v1391_v5 = vshrl.u32 %v3023_v56, 16  ;;  %v3051_v47 = vld [vmem:[%s3317_s1 + $0x10] sm:$0x3] }
  0x52   : > { %2298 = vmatprep.mubr.msk.bf16.mxu0 %vm414_vm5, %v2484_v20  ;;  %v1375_v22 = vrot.slane %v1373_v0, 5  ;;  %v1380_v9 = vrot.slane %v1378_v62, 4  ;;  %v1383_v26 = vrot.slane %v1381_v7, 5  ;;  %v3046_v41 = vrot.slane %v1387_v43, 5  ;;  %v2141_v20 = vld [vmem:[%s2758_s13 + $0x3c] sm:$0xf] }
  0x53   : > { %v1361_v27 = vrot.slane %v1360_v3, 4  ;;  %v1371_v8 = vrot.slane %v1370_v21, 4  ;;  %v1393_v29 = vrot.slane %v1391_v5, 4  ;;  %v1402_v36 = vshrl.u32 %v2138_v23, 16  ;;  %v2487_v3 = vld [vmem:[%s2758_s13 + $0x3c] sm:$0xff]  }
  0x54   : > { %v3059_v37 = vsel %vm2900_vm8, %v2046_v54, %v634_v33  ;;  %v636_v32 = vrot.slane %v634_v33, 4  ;;  %v1405_v38 = vshll.u32 %v2138_v23, 16  ;;  %v1411_v30 = vshll.u32 %v3041_v14, 16 }
  0x55   : > { %v631_v42 = vsel %vm2900_vm8, %v629_v18, %v630_v50  ;;  %v1397_v46 = vshll.u32 %v3044_v25, 16  ;;  %v1404_v49 = vrot.slane %v1402_v36, 4  ;;  %v1415_v17 = vshrl.u32 %v3041_v14, 16  ;;  %v3088_v18 = vld [vmem:[%s2758_s13 + $0x44] sm:$0x1] }
  0x56   : > { %v1384_v59 = vor.u32 %v1383_v26, %v1380_v9  ;;  %v1394_v61 = vor.u32 %v1393_v29, %v3046_v41  ;;  %v1407_v51 = vrot.slane %v1405_v38, 5  ;;  %v1413_v54 = vrot.slane %v1411_v30, 5  ;;  %v2081_v9 = vld [vmem:[%s2758_s13 + $0x24] sm:$0xf] }
  0x57   : > { %2253 = vmatmul.mubr.msk.bf16.gmra.mrb[4].mxu1 %vm414_vm5, %v2038_v39  ;;  %v3069_v39 = vld [vmem:[%s2758_s13 + $0x40] sm:$0xf]  ;;  %v1366_v50 = vsel %vm2803_vm4, %v1361_v27, %v1365_v11  ;;  %v1376_v24 = vsel %vm2803_vm4, %v1371_v8, %v1375_v22  ;;  %v1417_v55 = vrot.slane %v1415_v17, 4  ;;  %v1426_v33 = vshrl.u32 %v2141_v20, 16 }
  0x58   : > { %2258 = vmatprep.mubr.msk.bf16.mxu1 %vm414_vm5, %v2048_v1  ;;  %v1408_v57 = vor.u32 %v1407_v51, %v1404_v49  ;;  %v1421_v63 = vshll.u32 %v3054_v34, 16  ;;  %v1429_v0 = vshll.u32 %v2141_v20, 16  ;;  %v2050_v1 = vcombine.low %v3032_v10, %v631_v42  ;;  %v2488_v20 = vld [vmem:[%s2758_s13 + $0xc] sm:$0xff]   ;;  %v2153_v42 = vld [vmem:[%s2758_s13 + $0x18] sm:$0xe] }
  0x59   : > { %2299 = vmatmul.mubr.msk.bf16.vlgmr.msra.gmra.mrb[0].mxu0 %vm414_vm5, %v2485_v13  ;;  %v638_v11 = vsel %vm2900_vm8, %v636_v32, %v637_v19  ;;  %v1399_v12 = vrot.slane %v1397_v46, 5  ;;  %v1418_v13 = vor.u32 %v1417_v55, %v1413_v54  ;;  %v2145_v62 = vcombine.low %v1366_v50, %v1376_v24 }
  0x5a   : > { %2307 = vmatpush3.bf16.msra.mxu0 %v2994_v35  ;;  %2302 = vmatprep.mubr.msk.bf16.mxu0 %vm414_vm5, %v2486_v15  ;;  %v1435_v35 = vshll.u32 %v3069_v39, 16  ;;  %v1385_v7 = vrot.slane %v1384_v59, 4  ;;  %v1395_v43 = vrot.slane %v1394_v61, 4  ;;  %v1428_v23 = vrot.slane %v1426_v33, 4 }
  0x5b   : > { %2401 = vmatprep.subr.msk.bf16.mxu0 %vm427_vm1, %v3051_v47  ;;  %v1409_v15 = vrot.slane %v1408_v57, 4  ;;  %v1431_v21 = vrot.slane %v1429_v0, 5  ;;  %v1439_v22 = vshrl.u32 %v3069_v39, 16  ;;  %v1419_v10 = vrot.slane %v1418_v13, 4  ;;  %v2154_v13 = vld [vmem:[%s2758_s13 + $0x24] sm:$0xe] }
  0x5c   : > { %v3090_v5 = vrot.slane %v1435_v35, 5  ;;  %v1423_v19 = vrot.slane %v1421_v63, 5  ;;  %v2051_v27 = vcombine.low %v3059_v37, %v638_v11  ;;  %v1390_v8 = vsel %vm2803_vm4, %v1385_v7, %v3046_v41  ;;  %v2084_v63 = vld [vmem:[%s2758_s13 + $0x30] sm:$0xf]  ;;  %v2490_v11 = vld [vmem:[%s2758_s13 + $0x24] sm:$0xff]  }
  0x5d   : > { %v1441_v26 = vrot.slane %v1439_v22, 4  ;;  %v1400_v48 = vsel %vm2803_vm4, %v1395_v43, %v1399_v12  ;;  %v1445_v44 = vshll.u32 %v3088_v18, 16  ;;  %v924_v36 = vshrl.u32 %v2081_v9, 16  ;;  %v2155_v43 = vld [vmem:[%s2758_s13 + $0x30] sm:$0xe] }
  0x5e   : > { %v1424_v41 = vsel %vm2803_vm4, %v1419_v10, %v1423_v19  ;;  %v1569_v37 = vrot.slane %v2988_v40, 5  ;;  %v927_v32 = vshll.u32 %v2081_v9, 16  ;;  %v933_v38 = vshll.u32 %v2918_v45, 16 }
  0x5f   : > { %2259 = vmatmul.mubr.msk.bf16.vlgmr.msra.gmra.mrb[0].mxu1 %vm414_vm5, %v2049_v53  ;;  %v1432_v53 = vor.u32 %v1431_v21, %v1428_v23  ;;  %v1442_v29 = vor.u32 %v1441_v26, %v3090_v5  ;;  %v1622_v30 = vsel %vm427_vm1, %v3051_v47, 0  ;;  %v926_v46 = vrot.slane %v924_v36, 4  ;;  %v2491_v36 = vld [vmem:[%s2758_s13 + $0x30] sm:$0xff]  }
  0x60   : > { %2267 = vmatpush3.bf16.msra.mxu1 %v3008_v58  ;;  %2262 = vmatprep.mubr.msk.bf16.mxu1 %vm414_vm5, %v2050_v1  ;;  %v1414_v58 = vsel %vm2803_vm4, %v1409_v15, %v1413_v54  ;;  %v929_v49 = vrot.slane %v927_v32, 5  ;;  %v3122_v17 = vrot.slane %v933_v38, 5  ;;  %v937_v59 = vshrl.u32 %v2918_v45, 16  ;;  %v2489_v1 = vld [vmem:[%s2758_s13 + $0x18] sm:$0xff]  }
  0x61   : > { %2303 = vmatmul.mubr.msk.bf16.gmra.mrb[4].mxu0 %vm414_vm5, %v2487_v3  ;;  %2397 = vmatprep.subr.msk.bf16.mxu1 %vm427_vm1, %v2746_v2  ;;  %v2146_v2 = vcombine.low %v1390_v8, %v1400_v48  ;;  %v2147_v61 = vcombine.low %v1414_v58, %v1424_v41  ;;  %v1433_v51 = vrot.slane %v1432_v53, 4  ;;  %v1443_v54 = vrot.slane %v1442_v29, 4  ;;  %v2156_v32 = vld [vmem:[%s2758_s13 + $0x3c] sm:$0xe]  ;;  %s1830_s13 = sshll.u32 %s2732_s26, 4  ;;  %s3231_s13 = int_to_ptr.vmem [resolvable:$true] %s1830_s13 }
  0x62   : > { %2308 = vmatprep.mubr.msk.bf16.mxu0 %vm414_vm5, %v2145_v62  ;;  %v1447_v40 = vrot.slane %v1445_v44, 5  ;;  %v2157_v50 = vrot.slane %v2153_v42, 9  ;;  %v1571_v24 = vrot.slane %v1569_v37, 4  ;;  %v1572_v47 = vrot.slane %v2991_v6, 5  ;;  %s2492_s11 = scalar_lea.vmem %s3231_s13, 16  ;;  %p2499_p5 = scmp.lt.s32.totalorder %s3231_s13, %s2497_s14 }
  0x63   : > { %v939_v55 = vrot.slane %v937_v59, 4  ;;  %v930_v33 = vor.u32 %v929_v49, %v926_v46  ;;  %v943_v57 = vshll.u32 %v2921_v16, 16  ;;  %v1438_v6 = vsel %vm2803_vm4, %v1433_v51, %v3090_v5  ;;  %p2493_p1 = scmp.ne.s32.totalorder %s3231_s13, %s2492_s11  ;;  %p2500_p6 = scmp.lt.s32.totalorder %s2498_s23, %s2492_s11 }
  0x64   : > { %v1448_v0 = vsel %vm2803_vm4, %v1443_v54, %v1447_v40  ;;  %v1576_v35 = vrot.slane %v3023_v56, 5  ;;  %v1570_v12 = vsel %vm2900_vm8, %v2157_v50, %v1569_v37  ;;  %v1573_v16 = vsel %vm2900_vm8, %v1571_v24, %v1572_v47 }
  0x65   : > { %v940_v45 = vor.u32 %v939_v55, %v3122_v17  ;;  %v1583_v3 = vrot.slane %v3041_v14, 5  ;;  %v957_v62 = vshll.u32 %v2932_v52, 16  ;;  %v961_v7 = vshrl.u32 %v2932_v52, 16  ;;  %p2494_p2 = pnand %p2493_p1, %p2697_p3  ;;  %p2501_p7 = por %p2500_p6, %p2499_p5 }
  0x66   : > { %v948_v23 = vshrl.u32 %v2084_v63, 16  ;;  %v951_v15 = vshll.u32 %v2084_v63, 16  ;;  %v2148_v21 = vcombine.low %v1438_v6, %v1448_v0  ;;  %v931_v56 = vrot.slane %v930_v33, 4 }
  0x67   : > { %2263 = vmatmul.mubr.msk.bf16.gmra.mrb[4].mxu1 %vm414_vm5, %v2051_v27  ;;  %v941_v5 = vrot.slane %v940_v45, 4  ;;  %v945_v22 = vrot.slane %v943_v57, 5  ;;  %v2162_v10 = vcombine.low %v1570_v12, %v1573_v16  ;;  %v2158_v19 = vrot.slane %v2154_v13, 9  ;;  %p2495_p4 = pneg %p2494_p2 }
  0x68   : > { %2268 = vmatprep.mubr.msk.bf16.mxu1 %vm414_vm5, %v2488_v20  ;;  %v1578_v9 = vrot.slane %v1576_v35, 4  ;;  %v1579_v26 = vrot.slane %v3044_v25, 5  ;;  %v2159_v27 = vrot.slane %v2155_v43, 9  ;;  %v1585_v14 = vrot.slane %v1583_v3, 4 }
  0x69   : > { %2309 = vmatmul.mubr.msk.bf16.vlgmr.msra.gmra.mrb[0].mxu0 %vm414_vm5, %v2146_v2  ;;  %v1586_v8 = vrot.slane %v3054_v34, 5  ;;  %v959_v52 = vrot.slane %v957_v62, 5  ;;  %v963_v48 = vrot.slane %v961_v7, 4  ;;  %v950_v44 = vrot.slane %v948_v23, 4  ;;  %p2502_p8 = pnand %p2501_p7, %p2495_p4 }
  0x6a   : > { %2317 = vmatpush3.bf16.msra.mxu0 %v1622_v30  ;;  %2312 = vmatprep.mubr.msk.bf16.mxu0 %vm414_vm5, %v2147_v61  ;;  %v953_v58 = vrot.slane %v951_v15, 5  ;;  %v936_v25 = vsel %vm2803_vm4, %v931_v56, %v3122_v17  ;;  %v946_v53 = vsel %vm2803_vm4, %v941_v5, %v945_v22  ;;  %v1577_v34 = vsel %vm2900_vm8, %v2158_v19, %v1576_v35 }
  0x6b   : > { %v1590_v29 = vrot.slane %v3069_v39, 5  ;;  %v1584_v41 = vsel %vm2900_vm8, %v2159_v27, %v1583_v3  ;;  %v1587_v37 = vsel %vm2900_vm8, %v1585_v14, %v1586_v8  ;;  %v964_v38 = vor.u32 %v963_v48, %v959_v52 }
  0x6c   : > { %v967_v2 = vshll.u32 %v2945_v60, 16  ;;  %v2090_v30 = vcombine.low %v936_v25, %v946_v53  ;;  %v954_v20 = vor.u32 %v953_v58, %v950_v44  ;;  %v2164_v46 = vcombine.low %v1584_v41, %v1587_v37 }
  0x6d   : > { %v2160_v49 = vrot.slane %v2156_v32, 9  ;;  %v1592_v17 = vrot.slane %v1590_v29, 4  ;;  %v1593_v59 = vrot.slane %v3088_v18, 5  ;;  %v965_v39 = vrot.slane %v964_v38, 4 }
  0x6e   : > { %v969_v61 = vrot.slane %v967_v2, 5  ;;  %v955_v51 = vrot.slane %v954_v20, 4  ;;  %vm1729_vm9 = vcmask 125952   ;;  %vm1739_vm10 = vcmask 130048  }
  0x6f   : > { %2269 = vmatmul.mubr.msk.bf16.vlgmr.msra.gmra.mrb[0].mxu1 %vm414_vm5, %v2489_v1  ;;  %v1591_v60 = vsel %vm2900_vm8, %v2160_v49, %v1590_v29  ;;  %v1594_v54 = vsel %vm2900_vm8, %v1592_v17, %v1593_v59  ;;  %vm1762_vm11 = vcmask 122880  }
  0x70   : > { %2327 = vmatpush3.bf16.msra.mxu1 %v2755_v4  ;;  %2272 = vmatprep.mubr.msk.bf16.mxu1 %vm414_vm5, %v2490_v11  ;;  %v1580_v4 = vsel %vm2900_vm8, %v1578_v9, %v1579_v26  ;;  %v960_v18 = vsel %vm2803_vm4, %v955_v51, %v959_v52  ;;  %v970_v40 = vsel %vm2803_vm4, %v965_v39, %v969_v61 }
  0x71   : > { %2313 = vmatmul.mubr.msk.bf16.gmra.mrb[4].mxu0 %vm414_vm5, %v2148_v21  ;;  %v2163_v42 = vcombine.low %v1577_v34, %v1580_v4  ;;  %v2165_v50 = vcombine.low %v1591_v60, %v1594_v54  ;;  %v2091_v24 = vcombine.low %v960_v18, %v970_v40 }
  0x72   : > { %2318 = vmatprep.mubr.msk.bf16.mxu0 %vm414_vm5, %v2162_v10 }
  0x77   : > { %2273 = vmatmul.mubr.msk.bf16.gmra.mrb[4].mxu1 %vm414_vm5, %v2491_v36 }
  0x78   : > { %2282 = vmatprep.mubr.msk.bf16.mxu1 %vm414_vm5, %v2090_v30 }
  0x79   : > { %2319 = vmatmul.mubr.msk.bf16.vlgmr.msra.gmra.mrb[0].mxu0 %vm414_vm5, %v2163_v42 }
  0x7a   : > { %2322 = vmatprep.mubr.msk.bf16.mxu0 %vm414_vm5, %v2164_v46 }
  0x81   : > { %2323 = vmatmul.mubr.msk.bf16.gmra.mrb[4].mxu0 %vm414_vm5, %v2165_v50 }
  0x83   : > { %2283 = vmatmul.mubr.msk.bf16.vlgmr.msra.gmra.mrb[4].mxu1 %vm414_vm5, %v2091_v24 }
 0x142   : > { %v2270_v47 = vpop.f32.mrb[0].mxu1 }
 0x143   : > { %v824_v55 = vpop.f32.mrb[1].mxu1 }
 0x144   : > { %v2271_v33 = vpop.f32.mrb[2].mxu1 }
 0x145   : > { %v827_v45 = vpop.f32.mrb[3].mxu1 }
 0x14c   : > { %v2320_v57 = vpop.f32.mrb[0].mxu0 }
 0x14d   : > { %v2328_v28 = vadd.f32 %v2320_v57, %v2270_v47  ;;  %v1658_v63 = vpop.f32.mrb[1].mxu0 }
 0x14e   : > { %v2329_v6 = vadd.f32 %v1658_v63, %v824_v55  ;;  %v2321_v0 = vpop.f32.mrb[2].mxu0 }
 0x14f   : > { %v2185_v31 = vpack.c.bf16 %v2328_v28, %v2328_v28  ;;  %v2330_v35 = vadd.f32 %v2321_v0, %v2271_v33  ;;  %v1661_v1 = vpop.f32.mrb[3].mxu0  ;;  %v1767_v13 = vmul.f32 %v2328_v28, %v2328_v28  ;;  %v1743_v21 = vsel %vm1739_vm10, %v2328_v28, 0.0 }
 0x150   : > { %v2183_v11 = vpack.c.bf16 %v2329_v6, %v2329_v6  ;;  %v1765_v12 = vmul.f32 %v2329_v6, %v2329_v6  ;;  %v2331_v16 = vadd.f32 %v1661_v1, %v827_v45  ;;  %v1740_v62 = vsel %vm1739_vm10, %v2329_v6, 0.0 }
 0x151   : > { %1732 = vst.msk [vmem:[%s2729_s30 + $0x8] sm:$0xf] %vm1729_vm9, %v2185_v31  ;;  %v2186_v3 = vpack.c.bf16 %v2330_v35, %v2330_v35  ;;  %v1768_v5 = vmul.f32 %v2330_v35, %v2330_v35  ;;  %v1776_v27 = vsel %vm1739_vm10, %v1767_v13, 0.0  ;;  %v1745_v14 = vsel %vm1739_vm10, %v2330_v35, 0.0  ;;  %v1738_v13 = vld [vmem:[%s2732_s26] sm:$0x1] }
 0x152   : > { %1730 = vst.msk [vmem:[%s2729_s30] sm:$0xf] %vm1729_vm9, %v2183_v11  ;;  %v2184_v7 = vpack.c.bf16 %v2331_v16, %v2331_v16  ;;  %v1741_v43 = vsel %vm1739_vm10, %v2331_v16, 0.0  ;;  %v1766_v23 = vmul.f32 %v2331_v16, %v2331_v16  ;;  %v1773_v56 = vsel %vm1739_vm10, %v1765_v12, 0.0 }
 0x153   : > { %1733 = vst.msk [vmem:[%s2729_s30 + $0xc] sm:$0xf] %vm1729_vm9, %v2186_v3  ;;  %v1742_v15 = vadd.f32 %v1741_v43, %v1740_v62  ;;  %v1778_v34 = vsel %vm1739_vm10, %v1768_v5, 0.0 }
 0x154   : > { %1731 = vst.msk [vmem:[%s2729_s30 + $0x4] sm:$0xf] %vm1729_vm9, %v2184_v7  ;;  %v1774_v22 = vsel %vm1739_vm10, %v1766_v23, 0.0  ;;  %v2324_v10 = vpop.f32.mrb[4].mxu0  ;;  %v1764_v7 = vld [vmem:[%s2735_s25] sm:$0x1] }
 0x155   : > { %v1744_v19 = vadd.f32 %v1743_v21, %v1742_v15  ;;  %v1775_v9 = vadd.f32 %v1774_v22, %v1773_v56  ;;  %v1674_v26 = vpop.f32.mrb[5].mxu0 }
 0x156   : > { %v2284_v8 = vpop.f32.mrb[4].mxu1  ;;  %v2325_v52 = vpop.f32.mrb[6].mxu0 }
 0x157   : > { %v1777_v48 = vadd.f32 %v1776_v27, %v1775_v9  ;;  %v2332_v44 = vadd.f32 %v2324_v10, %v2284_v8  ;;  %v1050_v58 = vpop.f32.mrb[5].mxu1  ;;  %v1746_v25 = vadd.f32 %v1745_v14, %v1744_v19  ;;  %v1677_v53 = vpop.f32.mrb[7].mxu0 }
 0x158   : > { %v2333_v4 = vadd.f32 %v1674_v26, %v1050_v58  ;;  %v2285_v29 = vpop.f32.mrb[6].mxu1 }
 0x159   : > { %v2189_v36 = vpack.c.bf16 %v2332_v44, %v2332_v44  ;;  %v1779_v41 = vadd.f32 %v1778_v34, %v1777_v48  ;;  %v1053_v37 = vpop.f32.mrb[7].mxu1  ;;  %v2334_v30 = vadd.f32 %v2325_v52, %v2285_v29  ;;  %v1771_v46 = vmul.f32 %v2332_v44, %v2332_v44 }
 0x15a   : > { %v2187_v32 = vpack.c.bf16 %v2333_v4, %v2333_v4  ;;  %v1747_v38 = vsel %vm1739_vm10, %v2333_v4, 0.0  ;;  %v1769_v2 = vmul.f32 %v2333_v4, %v2333_v4  ;;  %v2335_v42 = vadd.f32 %v1677_v53, %v1053_v37 }
 0x15b   : > { %1736 = vst.msk [vmem:[%s2729_s30 + $0x18] sm:$0xf] %vm1729_vm9, %v2189_v36  ;;  %v1748_v20 = vadd.f32 %v1747_v38, %v1746_v25  ;;  %v2190_v17 = vpack.c.bf16 %v2334_v30, %v2334_v30  ;;  %v1751_v54 = vsel %vm1739_vm10, %v2332_v44, 0.0  ;;  %v1772_v18 = vmul.f32 %v2334_v30, %v2334_v30 }
 0x15c   : > { %1734 = vst.msk [vmem:[%s2729_s30 + $0x10] sm:$0xf] %vm1729_vm9, %v2187_v32  ;;  %v1780_v49 = vsel %vm1739_vm10, %v1769_v2, 0.0  ;;  %v2188_v39 = vpack.c.bf16 %v2335_v42, %v2335_v42  ;;  %v1749_v61 = vsel %vm1739_vm10, %v2335_v42, 0.0  ;;  %v1770_v51 = vmul.f32 %v2335_v42, %v2335_v42 }
 0x15d   : > { %v1781_v59 = vadd.f32 %v1780_v49, %v1779_v41  ;;  %1737 = vst.msk [vmem:[%s2729_s30 + $0x1c] sm:$0xf] %vm1729_vm9, %v2190_v17  ;;  %v1750_v60 = vadd.f32 %v1749_v61, %v1748_v20  ;;  %v1784_v47 = vsel %vm1739_vm10, %v1771_v46, 0.0  ;;  %v1753_v55 = vsel %vm1739_vm10, %v2334_v30, 0.0 }
 0x15e   : > { %1735 = vst.msk [vmem:[%s2729_s30 + $0x14] sm:$0xf] %vm1729_vm9, %v2188_v39  ;;  %v1782_v40 = vsel %vm1739_vm10, %v1770_v51, 0.0  ;;  %v1786_v57 = vsel %vm1739_vm10, %v1772_v18, 0.0  ;;  %s2178_s30 = sshll.u32 %s2606_s19, 4 }
 0x15f   : > { %v1752_v50 = vadd.f32 %v1751_v54, %v1750_v60  ;;  %v1783_v24 = vadd.f32 %v1782_v40, %v1781_v59  ;;  %s3229_s7 = scalar_lea.hbm %s3319_s3, %s2178_s30  ;;  %s3238_s9 = scalar_lea.hbm %s3320_s4, %s2178_s30 }
 0x161   : > { %v1754_v33 = vadd.f32 %v1753_v55, %v1752_v50  ;;  %v1785_v45 = vadd.f32 %v1784_v47, %v1783_v24 }
 0x163   : > { %v1755_v28 = vrot.slane %v1754_v33, 4  ;;  %v1787_v63 = vadd.f32 %v1786_v57, %v1785_v45 }
 0x165   : > { %v1756_v6 = vadd.f32 %v1755_v28, %v1754_v33  ;;  %v1788_v0 = vrot.slane %v1787_v63, 4 }
 0x167   : > { %v1757_v31 = vrot.slane %v1756_v6, 2  ;;  %v1789_v35 = vadd.f32 %v1788_v0, %v1787_v63 }
 0x169   : > { %v1758_v1 = vadd.f32 %v1757_v31, %v1756_v6  ;;  %v1790_v11 = vrot.slane %v1789_v35, 2 }
 0x16b   : > { %v1759_v12 = vrot.slane %v1758_v1, 1  ;;  %v1791_v16 = vadd.f32 %v1790_v11, %v1789_v35 }
 0x16d   : > { %v1760_v3 = vadd.f32 %v1759_v12, %v1758_v1  ;;  %v1792_v62 = vrot.slane %v1791_v16, 1 }
 0x16f   : > { %v1761_v43 = vadd.f32 %v1760_v3, %v1738_v13  ;;  %v1793_v23 = vadd.f32 %v1792_v62, %v1791_v16 }
 0x171   : > { %1763 = vst.msk [vmem:[%s2732_s26] sm:$0x1] %vm1762_vm11, %v1761_v43  ;;  %v1794_v15 = vadd.f32 %v1793_v23, %v1764_v7 }
 0x172   : > { %2505 = shalt.err (!%p2502_p8)
}
 0x173   : > { %s2506_s26 = scalar_lea.hbm %s3229_s7, 16  ;;  %s2510_s29 = scalar_lea.hbm %s3319_s3, 32 }
 0x174   : > { %p2507_p10 = scmp.ne.s32.totalorder %s3229_s7, %s2506_s26  ;;  %p2511_p13 = scmp.lt.u32.totalorder %s3229_s7, %s3319_s3 }
 0x175   : > { %p2512_p0 = scmp.lt.u32.totalorder %s2510_s29, %s2506_s26  ;;  %p2514_p2 = scmp.lt.u32.totalorder %s2506_s26, %s3229_s7 }
 0x176   : > { %p2508_p11 = pnand %p2507_p10, %p2697_p3 }
 0x177   : > { %p2513_p1 = por %p2512_p0, %p2511_p13 }
 0x178   : > { %p2509_p12 = pneg %p2508_p11 }
 0x179   : > { %p2515_p4 = por %p2514_p2, %p2513_p1 }
 0x17b   : > { %p2516_p5 = pnand %p2515_p4, %p2509_p12 }
 0x17d   : > { %2519 = shalt.err (!%p2516_p5)
}
 0x17e   : > { %2403 = dma.vmem_to_hbm [thread:$0]  (%p2697_p3), %s3231_s13, 16, %s3229_s7, %s1809_s10   ;;  %1795 = vst.msk [vmem:[%s2735_s25] sm:$0x1] %vm1762_vm11, %v1794_v15 }
 0x17f   : > { %s1813_s11 = scalar_lea.sflag [#allocation5], %s2718_s6  ;;  %s2520_s18 = scalar_lea.vmem %s3240_s24, 16 }
 0x180   : > { %p2521_p6 = scmp.ne.s32.totalorder %s3240_s24, %s2520_s18  ;;  %s2622_s14 = smov [#allocation4]  }
 0x181   : > { %s2524_s23 = sshll.u32 %s2622_s14, 4  ;;  %s2525_s23 = int_to_ptr.vmem [resolvable:$false] %s2524_s23 }
 0x182   : > { %p2522_p7 = pnand %p2521_p6, %p2697_p3  ;;  %s2526_s26 = scalar_lea.vmem %s2525_s23, 32 }
 0x183   : > { %p2527_p10 = scmp.lt.s32.totalorder %s3240_s24, %s2525_s23  ;;  %p2528_p11 = scmp.lt.s32.totalorder %s2526_s26, %s2520_s18 }
 0x184   : > { %p2523_p8 = pneg %p2522_p7 }
 0x185   : > { %p2529_p12 = por %p2528_p11, %p2527_p10 }
 0x187   : > { %p2530_p13 = pnand %p2529_p12, %p2523_p8 }
 0x189   : > { %2533 = shalt.err (!%p2530_p13)
}
 0x18a   : > { %s2534_s25 = scalar_lea.hbm %s3238_s9, 16  ;;  %s2538_s7 = scalar_lea.hbm %s3320_s4, 32 }
 0x18b   : > { %p2535_p0 = scmp.ne.s32.totalorder %s3238_s9, %s2534_s25  ;;  %p2539_p4 = scmp.lt.u32.totalorder %s3238_s9, %s3320_s4 }
 0x18c   : > { %p2540_p5 = scmp.lt.u32.totalorder %s2538_s7, %s2534_s25  ;;  %p2542_p7 = scmp.lt.u32.totalorder %s2534_s25, %s3238_s9 }
 0x18d   : > { %p2536_p1 = pnand %p2535_p0, %p2697_p3 }
 0x18e   : > { %p2541_p6 = por %p2540_p5, %p2539_p4 }
 0x18f   : > { %p2537_p2 = pneg %p2536_p1 }
 0x190   : > { %p2543_p8 = por %p2542_p7, %p2541_p6 }
 0x192   : > { %p2544_p10 = pnand %p2543_p8, %p2537_p2 }
 0x194   : > { %2547 = shalt.err (!%p2544_p10)
}
 0x195   : > { %2404 = dma.vmem_to_hbm [thread:$0]  (%p2697_p3), %s3240_s24, 16, %s3238_s9, %s1813_s11  }
 0x196 PF: > { %p2414_p11 = scmp.ge.s32.totalorder %s2618_s22, 2  ;;  %s1871_s12 = sand.u32 1, %s2590_s15  }
 0x197   : > { %s1872_s29 = scalar_lea.sflag [#allocation3], %s1871_s12 }
 0x198   : > { %p2408_p12 = pnand %p2414_p11, %p2707_p9 }
 0x19a   : > { %2581 = dma.done.wait (!%p2408_p12), %s1872_s29, 16  }
 0x19b   : > { %2583 = vsyncadd (!%p2408_p12), %s1872_s29, 4294967280  ;;  %s1880_s19 = scalar_lea.sflag [#allocation5], %s1871_s12 }
 0x19c   : > { %2585 = dma.done.wait (!%p2408_p12), %s1880_s19, 16  }
 0x19d   : > { %2587 = vsyncadd (!%p2408_p12), %s1880_s19, 4294967280  ;;  %s21_s22 = sadd.s32 1, %s2618_s22   ;;  %s3330_s27 = sld [smem:[#allocation8_spill]] }
 0x19e   : > { %p18_p13 = scmp.ge.s32.totalorder %s21_s22, 10   ;;  %s3331_s24 = sld [smem:[#allocation9_spill]] }
 0x19f   : > { %s3332_s15 = smov %s2594_s16  ;;  %s3333_s16 = smov %s2598_s17 }
 0x1a0   : > { %s3334_s17 = smov %s2715_s5  ;;  %s3335_s18 = smov %s2610_s20 }
 0x1a1   : > { %s3336_s19 = smov %s2614_s21  ;;  %20 = sbr.rel (!%p18_p13) target bundleno = 7 (0x7), region = 110 }
 0x1a3   : > { %s3337_s20 = smov %s3330_s27 }
 0x1a4   : > { %s3338_s21 = smov %s3331_s24 }
 0x1a8   :  { %1884 = vsyncpa [#allocation3], 1 }
 0x1a9   :  { %1886 = vsyncpa [#allocation3 + $0x1], 1 }
 0x1aa   :  { %1887 = vsyncpa [#allocation5], 1 }
 0x1ab   :  { %1889 = vsyncpa [#allocation5 + $0x1], 1 }

</bundles_post_ra>
